<compile_context>
chip_gen: v7x
topology: tpu7x:2x2x1
jax: 0.10.0
libtpu: 0.0.40
codegen_flags: <defaults>
</compile_context>

<pallas_src>
import functools

import jax
import jax.numpy as jnp
from jax.experimental import pallas as pl
from jax.experimental.pallas import tpu as pltpu


# ----------------------------- Pallas kernel ------------------------------ #
def _mlp_kernel(x_ref, g_ref, bta_ref, w1_ref, b1_ref, w2_ref, b2_ref,
                o_ref, xn_ref, acc_ref, *, eps):
    # x_ref   : (tm, D)  input rows (f32)
    # g_ref   : (1, D)   LayerNorm gamma
    # bta_ref : (1, D)   LayerNorm beta
    # w1_ref  : (D, th)  Linear1 weight tile (bf16)
    # b1_ref  : (1, th)  Linear1 bias tile (f32)
    # w2_ref  : (th, D)  Linear2 weight tile (bf16)
    # b2_ref  : (1, D)   Linear2 bias (f32)
    # o_ref   : (tm, D)  output rows
    # xn_ref  : (tm, D)  bf16 scratch: LayerNorm'ed rows (computed once per row-tile)
    # acc_ref : (tm, D)  f32 scratch: Linear2 accumulator over hidden tiles
    h_idx = pl.program_id(1)

    @pl.when(h_idx == 0)
    def _():
        # LayerNorm in f32, once per row-tile; store bf16 for the MXU.
        x = x_ref[...].astype(jnp.float32)
        mu = jnp.mean(x, axis=-1, keepdims=True)
        var = jnp.mean(jnp.square(x - mu), axis=-1, keepdims=True)
        xn = (x - mu) * jax.lax.rsqrt(var + eps)
        xn = xn * g_ref[...] + bta_ref[...]
        xn_ref[...] = xn.astype(xn_ref.dtype)
        acc_ref[...] = jnp.zeros_like(acc_ref)

    # Linear1 tile on the MXU (bf16 x bf16 -> f32), bias, exact (erf) GELU.
    h = jnp.dot(xn_ref[...], w1_ref[...], preferred_element_type=jnp.float32)
    h = h + b1_ref[...]
    h = 0.5 * h * (1.0 + jax.lax.erf(h * 0.7071067811865476))
    # TODO(synk): nn.Dropout(p=0.0) is identity at inference; stochastic dropout
    # (pltpu.prng_*) is intentionally not implemented here.

    # Linear2: accumulate over hidden tiles in the resident f32 accumulator.
    acc_ref[...] += jnp.dot(h.astype(w2_ref.dtype), w2_ref[...],
                            preferred_element_type=jnp.float32)

    @pl.when(h_idx == pl.num_programs(1) - 1)
    def _():
        # Bias add only in the epilogue, off the steady-state MXU path.
        o_ref[...] = (acc_ref[...] + b2_ref[...]).astype(o_ref.dtype)


def _pick_tile(total, candidates):
    for c in candidates:
        if c <= total and total % c == 0:
            return c
    return total  # fall back to the full extent (always a legal block)


def _mlp_pallas(x2d, gamma, beta, w1, b1, w2, b2, *, eps, tm, th):
    Mp, D = x2d.shape
    H = w1.shape[1]
    grid = (Mp // tm, H // th)
    kernel = functools.partial(_mlp_kernel, eps=eps)
    return pl.pallas_call(
        kernel,
        out_shape=jax.ShapeDtypeStruct((Mp, D), x2d.dtype),
        grid=grid,
        in_specs=[
            pl.BlockSpec((tm, D), lambda i, j: (i, 0)),   # x row tile
            pl.BlockSpec((1, D), lambda i, j: (0, 0)),    # gamma
            pl.BlockSpec((1, D), lambda i, j: (0, 0)),    # beta
            pl.BlockSpec((D, th), lambda i, j: (0, j)),   # W1 hidden tile
            pl.BlockSpec((1, th), lambda i, j: (0, j)),   # b1 hidden tile
            pl.BlockSpec((th, D), lambda i, j: (j, 0)),   # W2 hidden tile
            pl.BlockSpec((1, D), lambda i, j: (0, 0)),    # b2
        ],
        out_specs=pl.BlockSpec((tm, D), lambda i, j: (i, 0)),
        scratch_shapes=[
            pltpu.VMEM((tm, D), jnp.bfloat16),   # LayerNorm'ed rows (MXU input)
            pltpu.VMEM((tm, D), jnp.float32),    # Linear2 accumulator
        ],
        compiler_params=pltpu.CompilerParams(
            dimension_semantics=("parallel", "arbitrary"),
        ),
    )(x2d, gamma, beta, w1, b1, w2, b2)


# ----------------------------- Module wrapper ------------------------------ #
class MLP:
    """Pallas port of the PyTorch MLP module (LayerNorm -> Linear -> GELU -> Linear)."""

    def __init__(self, dim, hidden_dim=None, dropout=0.0, key=None, eps=1e-5):
        hidden_dim = hidden_dim if hidden_dim else 4 * dim
        self.dim = dim
        self.hidden_dim = hidden_dim
        self.dropout = dropout          # p=0.0 -> identity (inference semantics)
        self.eps = eps
        if key is None:
            key = jax.random.PRNGKey(0)
        k1, k2, k3, k4 = jax.random.split(key, 4)

        # PyTorch-style uniform(-1/sqrt(fan_in), 1/sqrt(fan_in)) init.
        b1_bound = 1.0 / float(dim) ** 0.5
        b2_bound = 1.0 / float(hidden_dim) ** 0.5
        # Weights stored (in, out) so the kernel does row-major x @ W.
        self.w1 = jax.random.uniform(k1, (dim, hidden_dim),
                                     minval=-b1_bound, maxval=b1_bound,
                                     dtype=jnp.float32)
        self.b1 = jax.random.uniform(k2, (hidden_dim,),
                                     minval=-b1_bound, maxval=b1_bound,
                                     dtype=jnp.float32)
        self.w2 = jax.random.uniform(k3, (hidden_dim, dim),
                                     minval=-b2_bound, maxval=b2_bound,
                                     dtype=jnp.float32)
        self.b2 = jax.random.uniform(k4, (dim,),
                                     minval=-b2_bound, maxval=b2_bound,
                                     dtype=jnp.float32)
        # LayerNorm affine params (PyTorch default init).
        self.gamma = jnp.ones((dim,), dtype=jnp.float32)
        self.beta = jnp.zeros((dim,), dtype=jnp.float32)
        # bf16 copies for the MXU (cast once, not per call).
        self.w1_bf16 = self.w1.astype(jnp.bfloat16)
        self.w2_bf16 = self.w2.astype(jnp.bfloat16)

    def __call__(self, x):
        # x: (..., D) float32
        orig_shape = x.shape
        D = orig_shape[-1]
        assert D == self.dim
        x2d = x.reshape(-1, D)
        M = x2d.shape[0]

        # Pad the row count to sublane granularity (multiple of 8).
        Mp = ((M + 7) // 8) * 8
        if Mp != M:
            x2d = jnp.pad(x2d, ((0, Mp - M), (0, 0)))

        # Tile sizes: big row tiles, 128-aligned hidden tiles (lane-dense MXU use).
        tm = _pick_tile(Mp, (512, 256, 128, 64, 32, 16, 8))
        th = _pick_tile(self.hidden_dim, (512, 256, 128))

        out = _mlp_pallas(
            x2d,
            self.gamma.reshape(1, -1), self.beta.reshape(1, -1),
            self.w1_bf16, self.b1.reshape(1, -1),
            self.w2_bf16, self.b2.reshape(1, -1),
            eps=self.eps, tm=tm, th=th)

        return out[:M].reshape(orig_shape)


# --------------------------------- main ------------------------------------ #
if __name__ == "__main__":
    key = jax.random.PRNGKey(0)

    B, S, D = 2, 8, 32                 # -> hidden_dim = 4*D = 128, M = 16 rows
    model = MLP(dim=D, key=key)

    x = jax.random.normal(jax.random.fold_in(key, 123), (B, S, D),
                          dtype=jnp.float32)

    y = jax.block_until_ready(model(x))

    # Pure-JAX f32 reference (same semantics as the PyTorch module in eval mode).
    def ref(x):
        mu = jnp.mean(x, axis=-1, keepdims=True)
        var = jnp.mean(jnp.square(x - mu), axis=-1, keepdims=True)
        xn = (x - mu) / jnp.sqrt(var + model.eps) * model.gamma + model.beta
        h = xn @ model.w1 + model.b1
        h = 0.5 * h * (1.0 + jax.lax.erf(h * 0.7071067811865476))   # exact GELU
        return h @ model.w2 + model.b2

    y_ref = ref(x)

    assert y.shape == (B, S, D), y.shape
    # bf16 MXU inputs with f32 accumulation -> loosen tolerance vs the f32 ref.
    assert jnp.allclose(y, y_ref, atol=5e-2, rtol=5e-2), (
        "mismatch vs reference MLP: max abs err = "
        f"{float(jnp.max(jnp.abs(y - y_ref)))}")

    print("KERNEL_OK")
</pallas_src>

<mosaic_0001>
module attributes {stable_mosaic.version = 11 : i64} {
  func.func @_mlp_kernel(%arg0: i32, %arg1: i32, %arg2: memref<16x32xf32, #tpu.memory_space<vmem>>, %arg3: memref<1x32xf32, #tpu.memory_space<vmem>>, %arg4: memref<1x32xf32, #tpu.memory_space<vmem>>, %arg5: memref<32x128xbf16, #tpu.memory_space<vmem>>, %arg6: memref<1x128xf32, #tpu.memory_space<vmem>>, %arg7: memref<128x32xbf16, #tpu.memory_space<vmem>>, %arg8: memref<1x32xf32, #tpu.memory_space<vmem>>, %arg9: memref<16x32xf32, #tpu.memory_space<vmem>>, %arg10: memref<16x32xbf16, #tpu.memory_space<vmem>>, %arg11: memref<16x32xf32, #tpu.memory_space<vmem>>) attributes {dimension_semantics = [#tpu.dimension_semantics<parallel>, #tpu.dimension_semantics<arbitrary>], iteration_bounds = array<i64: 1, 1>, scalar_prefetch = 0 : i64, scratch_operands = 2 : i64, tpu.core_type = #tpu.core_type<tc>, window_params = [{transform_indices = @transform_0, window_bounds = array<i64: 16, 32>}, {pipeline_mode = #tpu.pipeline_mode<synchronous>, transform_indices = @transform_1, window_bounds = array<i64: 1, 32>}, {pipeline_mode = #tpu.pipeline_mode<synchronous>, transform_indices = @transform_2, window_bounds = array<i64: 1, 32>}, {transform_indices = @transform_3, window_bounds = array<i64: 32, 128>}, {transform_indices = @transform_4, window_bounds = array<i64: 1, 128>}, {transform_indices = @transform_5, window_bounds = array<i64: 128, 32>}, {pipeline_mode = #tpu.pipeline_mode<synchronous>, transform_indices = @transform_6, window_bounds = array<i64: 1, 32>}, {transform_indices = @transform_7, window_bounds = array<i64: 16, 32>}]} {
    %c0_i32 = arith.constant 0 : i32
    %0 = arith.cmpi eq, %arg1, %c0_i32 : i32
    %1 = arith.extui %0 : i1 to i32
    %c0_i32_0 = arith.constant 0 : i32
    %2 = arith.cmpi ne, %1, %c0_i32_0 : i32
    scf.if %2 {
      %c0_18 = arith.constant 0 : index
      %c0_19 = arith.constant 0 : index
      %26 = vector.load %arg2[%c0_18, %c0_19] : memref<16x32xf32, #tpu.memory_space<vmem>>, vector<16x32xf32>
      %cst_20 = arith.constant dense<0.000000e+00> : vector<16xf32>
      %27 = vector.multi_reduction <add>, %26, %cst_20 [1] : vector<16x32xf32> to vector<16xf32>
      %28 = vector.shape_cast %27 : vector<16xf32> to vector<16x1xf32>
      %cst_21 = arith.constant 3.200000e+01 : f32
      %29 = vector.broadcast %cst_21 : f32 to vector<16x1xf32>
      %30 = arith.divf %28, %29 : vector<16x1xf32>
      %31 = vector.broadcast %30 : vector<16x1xf32> to vector<16x32xf32>
      %32 = arith.subf %26, %31 : vector<16x32xf32>
      %33 = arith.mulf %32, %32 : vector<16x32xf32>
      %cst_22 = arith.constant dense<0.000000e+00> : vector<16xf32>
      %34 = vector.multi_reduction <add>, %33, %cst_22 [1] : vector<16x32xf32> to vector<16xf32>
      %35 = vector.shape_cast %34 : vector<16xf32> to vector<16x1xf32>
      %cst_23 = arith.constant 3.200000e+01 : f32
      %36 = vector.broadcast %cst_23 : f32 to vector<16x1xf32>
      %37 = arith.divf %35, %36 : vector<16x1xf32>
      %38 = vector.broadcast %30 : vector<16x1xf32> to vector<16x32xf32>
      %39 = arith.subf %26, %38 : vector<16x32xf32>
      %cst_24 = arith.constant 9.99999974E-6 : f32
      %40 = vector.broadcast %cst_24 : f32 to vector<16x1xf32>
      %41 = arith.addf %37, %40 : vector<16x1xf32>
      %42 = math.rsqrt %41 : vector<16x1xf32>
      %43 = vector.broadcast %42 : vector<16x1xf32> to vector<16x32xf32>
      %44 = arith.mulf %39, %43 : vector<16x32xf32>
      %c0_25 = arith.constant 0 : index
      %c0_26 = arith.constant 0 : index
      %45 = vector.load %arg3[%c0_25, %c0_26] : memref<1x32xf32, #tpu.memory_space<vmem>>, vector<1x32xf32>
      %46 = vector.broadcast %45 : vector<1x32xf32> to vector<16x32xf32>
      %47 = arith.mulf %44, %46 : vector<16x32xf32>
      %c0_27 = arith.constant 0 : index
      %c0_28 = arith.constant 0 : index
      %48 = vector.load %arg4[%c0_27, %c0_28] : memref<1x32xf32, #tpu.memory_space<vmem>>, vector<1x32xf32>
      %49 = vector.broadcast %48 : vector<1x32xf32> to vector<16x32xf32>
      %50 = arith.addf %47, %49 : vector<16x32xf32>
      %51 = arith.truncf %50 : vector<16x32xf32> to vector<16x32xbf16>
      %c0_29 = arith.constant 0 : index
      %c0_30 = arith.constant 0 : index
      %52 = vector.load %arg10[%c0_29, %c0_30] : memref<16x32xbf16, #tpu.memory_space<vmem>>, vector<16x32xbf16>
      tpu.vector_store %arg10[%c0_29, %c0_30], %51 {strides = array<i32>} : memref<16x32xbf16, #tpu.memory_space<vmem>>, vector<16x32xbf16>,
      %cst_31 = arith.constant 0.000000e+00 : f32
      %53 = vector.broadcast %cst_31 : f32 to vector<16x32xf32>
      %c0_32 = arith.constant 0 : index
      %c0_33 = arith.constant 0 : index
      %54 = vector.load %arg11[%c0_32, %c0_33] : memref<16x32xf32, #tpu.memory_space<vmem>>, vector<16x32xf32>
      tpu.vector_store %arg11[%c0_32, %c0_33], %53 {strides = array<i32>} : memref<16x32xf32, #tpu.memory_space<vmem>>, vector<16x32xf32>,
    } else {
    }
    %c0 = arith.constant 0 : index
    %c0_1 = arith.constant 0 : index
    %3 = vector.load %arg10[%c0, %c0_1] : memref<16x32xbf16, #tpu.memory_space<vmem>>, vector<16x32xbf16>
    %c0_2 = arith.constant 0 : index
    %c0_3 = arith.constant 0 : index
    %4 = vector.load %arg5[%c0_2, %c0_3] : memref<32x128xbf16, #tpu.memory_space<vmem>>, vector<32x128xbf16>
    %cst = arith.constant dense<0.000000e+00> : vector<16x128xf32>
    %5 = tpu.matmul %3, %4, %cst {dimension_numbers = #tpu.dot_dimension_numbers<[1], [0], [0], [1], [0, 0, 1, 1], [], []>} : vector<16x32xbf16>, vector<32x128xbf16>, vector<16x128xf32> -> vector<16x128xf32>
    %c0_4 = arith.constant 0 : index
    %c0_5 = arith.constant 0 : index
    %6 = vector.load %arg6[%c0_4, %c0_5] : memref<1x128xf32, #tpu.memory_space<vmem>>, vector<1x128xf32>
    %7 = vector.broadcast %6 : vector<1x128xf32> to vector<16x128xf32>
    %8 = arith.addf %5, %7 : vector<16x128xf32>
    %cst_6 = arith.constant 5.000000e-01 : f32
    %9 = vector.broadcast %cst_6 : f32 to vector<16x128xf32>
    %10 = arith.mulf %9, %8 : vector<16x128xf32>
    %cst_7 = arith.constant 0.707106769 : f32
    %11 = vector.broadcast %cst_7 : f32 to vector<16x128xf32>
    %12 = arith.mulf %8, %11 : vector<16x128xf32>
    %13 = math.erf %12 : vector<16x128xf32>
    %cst_8 = arith.constant 1.000000e+00 : f32
    %14 = vector.broadcast %cst_8 : f32 to vector<16x128xf32>
    %15 = arith.addf %14, %13 : vector<16x128xf32>
    %16 = arith.mulf %10, %15 : vector<16x128xf32>
    %c0_9 = arith.constant 0 : index
    %c0_10 = arith.constant 0 : index
    %17 = vector.load %arg11[%c0_9, %c0_10] : memref<16x32xf32, #tpu.memory_space<vmem>>, vector<16x32xf32>
    %18 = arith.truncf %16 : vector<16x128xf32> to vector<16x128xbf16>
    %c0_11 = arith.constant 0 : index
    %c0_12 = arith.constant 0 : index
    %19 = vector.load %arg7[%c0_11, %c0_12] : memref<128x32xbf16, #tpu.memory_space<vmem>>, vector<128x32xbf16>
    %cst_13 = arith.constant dense<0.000000e+00> : vector<16x32xf32>
    %20 = tpu.matmul %18, %19, %cst_13 {dimension_numbers = #tpu.dot_dimension_numbers<[1], [0], [0], [1], [0, 0, 1, 1], [], []>} : vector<16x128xbf16>, vector<128x32xbf16>, vector<16x32xf32> -> vector<16x32xf32>
    %21 = arith.addf %17, %20 : vector<16x32xf32>
    %c0_14 = arith.constant 0 : index
    %c0_15 = arith.constant 0 : index
    %22 = vector.load %arg11[%c0_14, %c0_15] : memref<16x32xf32, #tpu.memory_space<vmem>>, vector<16x32xf32>
    tpu.vector_store %arg11[%c0_14, %c0_15], %21 {strides = array<i32>} : memref<16x32xf32, #tpu.memory_space<vmem>>, vector<16x32xf32>,
    %c0_i32_16 = arith.constant 0 : i32
    %23 = arith.cmpi eq, %arg1, %c0_i32_16 : i32
    %24 = arith.extui %23 : i1 to i32
    %c0_i32_17 = arith.constant 0 : i32
    %25 = arith.cmpi ne, %24, %c0_i32_17 : i32
    scf.if %25 {
      %c0_18 = arith.constant 0 : index
      %c0_19 = arith.constant 0 : index
      %26 = vector.load %arg11[%c0_18, %c0_19] : memref<16x32xf32, #tpu.memory_space<vmem>>, vector<16x32xf32>
      %c0_20 = arith.constant 0 : index
      %c0_21 = arith.constant 0 : index
      %27 = vector.load %arg8[%c0_20, %c0_21] : memref<1x32xf32, #tpu.memory_space<vmem>>, vector<1x32xf32>
      %28 = vector.broadcast %27 : vector<1x32xf32> to vector<16x32xf32>
      %29 = arith.addf %26, %28 : vector<16x32xf32>
      %c0_22 = arith.constant 0 : index
      %c0_23 = arith.constant 0 : index
      %30 = vector.load %arg9[%c0_22, %c0_23] : memref<16x32xf32, #tpu.memory_space<vmem>>, vector<16x32xf32>
      tpu.vector_store %arg9[%c0_22, %c0_23], %29 {strides = array<i32>} : memref<16x32xf32, #tpu.memory_space<vmem>>, vector<16x32xf32>,
    } else {
    }
    return
  }
  func.func @transform_0(%arg0: i32, %arg1: i32) -> (i32, i32) {
    %c0_i32 = arith.constant 0 : i32
    %c0_i32_0 = arith.constant 0 : i32
    return %arg0, %c0_i32 : i32, i32
  }
  func.func @transform_1(%arg0: i32, %arg1: i32) -> (i32, i32) {
    %c0_i32 = arith.constant 0 : i32
    %c0_i32_0 = arith.constant 0 : i32
    %c0_i32_1 = arith.constant 0 : i32
    return %c0_i32, %c0_i32_0 : i32, i32
  }
  func.func @transform_2(%arg0: i32, %arg1: i32) -> (i32, i32) {
    %c0_i32 = arith.constant 0 : i32
    %c0_i32_0 = arith.constant 0 : i32
    %c0_i32_1 = arith.constant 0 : i32
    return %c0_i32, %c0_i32_0 : i32, i32
  }
  func.func @transform_3(%arg0: i32, %arg1: i32) -> (i32, i32) {
    %c0_i32 = arith.constant 0 : i32
    %c0_i32_0 = arith.constant 0 : i32
    return %c0_i32, %arg1 : i32, i32
  }
  func.func @transform_4(%arg0: i32, %arg1: i32) -> (i32, i32) {
    %c0_i32 = arith.constant 0 : i32
    %c0_i32_0 = arith.constant 0 : i32
    return %c0_i32, %arg1 : i32, i32
  }
  func.func @transform_5(%arg0: i32, %arg1: i32) -> (i32, i32) {
    %c0_i32 = arith.constant 0 : i32
    %c0_i32_0 = arith.constant 0 : i32
    return %arg1, %c0_i32 : i32, i32
  }
  func.func @transform_6(%arg0: i32, %arg1: i32) -> (i32, i32) {
    %c0_i32 = arith.constant 0 : i32
    %c0_i32_0 = arith.constant 0 : i32
    %c0_i32_1 = arith.constant 0 : i32
    return %c0_i32, %c0_i32_0 : i32, i32
  }
  func.func @transform_7(%arg0: i32, %arg1: i32) -> (i32, i32) {
    %c0_i32 = arith.constant 0 : i32
    %c0_i32_0 = arith.constant 0 : i32
    return %arg0, %c0_i32 : i32, i32
  }
}

</mosaic_0001>

<bundles_post_ra>
// kernel: tpu_custom_call.1
= control target key start
LH: loop header
LB: loop body
LE: loop exit
PB: predicated region body
PF: predicated region fallthrough
CT: control target
= control target key end

     0   :  { %vm34_vm0 = vcmask 261120   ;;  %s526_s0 = inlined_call_operand.vmem [shape: f32[16,32], index: 0, kind: input, shape index: {}]   ;;  %s527_s1 = inlined_call_operand.vmem [shape: f32[1,32], index: 1, kind: input, shape index: {}]   ;;  %s528_s2 = inlined_call_operand.vmem [shape: f32[1,32], index: 2, kind: input, shape index: {}]   ;;  %s529_s3 = inlined_call_operand.vmem [shape: bf16[32,128], index: 3, kind: input, shape index: {}]   ;;  %s530_s4 = inlined_call_operand.vmem [shape: f32[1,128], index: 4, kind: input, shape index: {}]   ;;  %s531_s5 = inlined_call_operand.vmem [shape: bf16[128,32], index: 5, kind: input, shape index: {}]   ;;  %s532_s6 = inlined_call_operand.vmem [shape: f32[1,32], index: 6, kind: input, shape index: {}]   ;;  %s533_s7 = inlined_call_operand.hbm [shape: f32[16,32], index: 7, kind: output, shape index: {}]  }
   0x1   :  { %v32_v0 = vld [vmem:[%s526_s0] sm:$0xff]  ;;  %v33_v1 = vld [vmem:[%s526_s0 + $0x8] sm:$0xff] }
   0x2   :  { %v35_v2 = vsel %vm34_vm0, %v32_v0, 0.0  ;;  %v38_v3 = vsel %vm34_vm0, %v33_v1, 0.0 }
   0x3   :  { %36 = vadd.xlane.f32.xlu0 %v35_v2 }
   0x7   :  { %39 = vadd.xlane.f32.xlu0 %v38_v3 }
   0x8   :  { %12 = vsyncpa [#allocation5], 0  ;;  %v367_v14 = vld [vmem:[%s529_s3] sm:$0xff]   ;;  %v409_v15 = vmov 0.0   ;;  %v368_v16 = vld [vmem:[%s529_s3 + $0x8] sm:$0xff]   ;;  %vm410_vm1 = vmmov 0  }
   0x9   :  { %334 = vmatprep.subr.bf16.mxu0 %v409_v15  ;;  %82 = vst.msk [vmem:[#allocation3] sm:$0xff] %vm34_vm0, %v409_v15  ;;  %83 = vst.msk [vmem:[#allocation3 + $0x8] sm:$0xff] %vm34_vm0, %v409_v15  ;;  %342 = vmatprep.subr.bf16.mxu1 %v409_v15  ;;  %v369_v17 = vld [vmem:[%s531_s5] sm:$0xff]   ;;  %v370_v18 = vld [vmem:[%s531_s5 + $0x8] sm:$0xff]   ;;  %s411_s27 = smov [#allocation4]  }
   0xa   :  { %335 = vmatpush3.bf16.msra.mxu0 %v367_v14  ;;  %338 = vmatprep.mubr.msk.bf16.mxu0 %vm410_vm1, %v409_v15  ;;  %v307_v27 = vld [vmem:[%s527_s1] ss:$0 sm:$0xff]  ;;  %v371_v37 = vld [vmem:[%s531_s5 + $0x10] sm:$0xff]   ;;  %v372_v38 = vld [vmem:[%s531_s5 + $0x18] sm:$0xff]   ;;  %s296_s0 = sshll.u32 %s411_s27, 4  ;;  %s297_s0 = int_to_ptr.vmem [resolvable:$true] %s296_s0 }
   0xb   :  { %336 = vmatprep.subr.bf16.mxu0 %v409_v15  ;;  %358 = vmatprep.mubr.msk.bf16.mxu1 %vm410_vm1, %v409_v15  ;;  %v308_v31 = vld [vmem:[%s528_s2] ss:$0 sm:$0xff]  ;;  %v374_v40 = vld [vmem:[%s531_s5 + $0x28] sm:$0xff]   ;;  %v375_v41 = vld [vmem:[%s531_s5 + $0x30] sm:$0xff]   ;;  %s385_s28 = scalar_lea.vmem %s297_s0, 256  ;;  %p390_p1 = scmp.lt.s32.totalorder %s297_s0, %s297_s0 }
   0xc   :  { %343 = vmatpush3.bf16.msra.mxu1 %v369_v17  ;;  %v373_v39 = vld [vmem:[%s531_s5 + $0x20] sm:$0xff]   ;;  %v376_v42 = vld [vmem:[%s531_s5 + $0x38] sm:$0xff]   ;;  %p386_p0 = scmp.ne.s32.totalorder %s297_s0, %s385_s28  ;;  %p391_p2 = scmp.lt.s32.totalorder %s385_s28, %s385_s28 }
   0xd   :  { %344 = vmatprep.subr.bf16.mxu1 %v409_v15  ;;  %v309_v43 = vld [vmem:[%s530_s4] ss:$0 sm:$0xff] }
   0xe   :  { %337 = vmatpush3.bf16.msra.mxu0 %v368_v16  ;;  %p392_p3 = por %p391_p2, %p390_p1 }
  0x10   :  { %345 = vmatpush3.bf16.msra.mxu1 %v370_v18  ;;  %v163_v61 = vld [vmem:[#allocation3] sm:$0xff]  ;;  %v164_v63 = vld [vmem:[#allocation3 + $0x8] sm:$0xff]  ;;  %p393_p4 = pnand %p392_p3, %p386_p0 }
  0x11   :  { %346 = vmatprep.subr.bf16.mxu1 %v409_v15 }
  0x14   :  { %347 = vmatpush3.bf16.msra.mxu1 %v371_v37 }
  0x15   :  { %348 = vmatprep.subr.bf16.mxu1 %v409_v15 }
  0x18   :  { %349 = vmatpush3.bf16.msra.mxu1 %v372_v38 }
  0x19   :  { %350 = vmatprep.subr.bf16.mxu1 %v409_v15 }
  0x1c   :  { %351 = vmatpush3.bf16.msra.mxu1 %v373_v39 }
  0x1d   :  { %352 = vmatprep.subr.bf16.mxu1 %v409_v15 }
  0x20   :  { %353 = vmatpush3.bf16.msra.mxu1 %v374_v40 }
  0x21   :  { %354 = vmatprep.subr.bf16.mxu1 %v409_v15 }
  0x24   :  { %355 = vmatpush3.bf16.msra.mxu1 %v375_v41 }
  0x25   :  { %356 = vmatprep.subr.bf16.mxu1 %v409_v15 }
  0x28   :  { %357 = vmatpush3.bf16.msra.mxu1 %v376_v42 }
  0x90   :  { %v37_v4 = vpop.xlane.xlu0 %36 }
  0x91   :  { %v42_v5 = vmul.f32 0.03125, %v37_v4 }
  0x93   :  { %v44_v6 = vsub.f32 %v32_v0, %v42_v5  ;;  %v321_v5 = vld [vmem:[%s532_s6] ss:$0 sm:$0xff] }
  0x94   :  { %v40_v7 = vpop.xlane.xlu0 %39 }
  0x95   :  { %v43_v8 = vmul.f32 0.03125, %v40_v7  ;;  %v46_v9 = vmul.f32 %v44_v6, %v44_v6 }
  0x97   :  { %v45_v10 = vsub.f32 %v33_v1, %v43_v8  ;;  %v48_v11 = vsel %vm34_vm0, %v46_v9, 0.0 }
  0x98   :  { %49 = vadd.xlane.f32.xlu1 %v48_v11 }
  0x99   :  { %v47_v12 = vmul.f32 %v45_v10, %v45_v10 }
  0x9b   :  { %v51_v13 = vsel %vm34_vm0, %v47_v12, 0.0 }
  0x9c   :  { %52 = vadd.xlane.f32.xlu1 %v51_v13 }
 0x125   :  { %v50_v19 = vpop.xlane.xlu1 %49 }
 0x126   :  { %v54_v20 = vmul.f32 0.03125, %v50_v19 }
 0x128   :  { %v56_v21 = vadd.f32 1e-05, %v54_v20 }
 0x129   :  { %v53_v22 = vpop.xlane.xlu1 %52 }
 0x12a   :  { %377 = vrsqrt.f32 %v56_v21  ;;  %v55_v23 = vmul.f32 0.03125, %v53_v22 }
 0x12c   :  { %v57_v24 = vadd.f32 1e-05, %v55_v23 }
 0x12e   :  { %379 = vrsqrt.f32 %v57_v24 }
 0x134   :  { %v378_v25 = vpop.eup %377 }
 0x135   :  { %v60_v26 = vmul.f32 %v378_v25, %v44_v6 }
 0x137   :  { %v69_v29 = vmul.f32 %v307_v27, %v60_v26 }
 0x138   :  { %v380_v28 = vpop.eup %379 }
 0x139   :  { %v61_v30 = vmul.f32 %v380_v28, %v45_v10  ;;  %v78_v33 = vadd.f32 %v308_v31, %v69_v29 }
 0x13b   :  { %v70_v32 = vmul.f32 %v307_v27, %v61_v30 }
 0x13d   :  { %v79_v34 = vadd.f32 %v308_v31, %v70_v32 }
 0x13f   :  { %v80_v35 = vpack.c.bf16 %v79_v34, %v78_v33 }
 0x141   :  { %81 = vst.msk [vmem:[#allocation2] sm:$0xff] %vm34_vm0, %v80_v35 }
 0x148   :  { %v84_v36 = vld [vmem:[#allocation2] sm:$0xff] }
 0x149   :  { %339 = vmatmul.mubr.msk.bf16.vlgmr.msra.gmra.mrb[0].mxu0 %vm34_vm0, %v84_v36 }
 0x21c   :  { %v146_v44 = vpop.f32.mrb[0].mxu0 }
 0x21d   :  { %v147_v45 = vadd.f32 %v309_v43, %v146_v44  ;;  %v340_v46 = vpop.f32.mrb[1].mxu0 }
 0x21e   :  { %v149_v47 = vpop.f32.mrb[2].mxu0 }
 0x21f   :  { %v155_v48 = vmul.f32 0.70710677, %v147_v45  ;;  %v150_v49 = vadd.f32 %v309_v43, %v149_v47  ;;  %v341_v50 = vpop.f32.mrb[3].mxu0  ;;  %v153_v55 = vmul.f32 0.5, %v147_v45 }
 0x221   :  { %381 = verf.f32 %v155_v48  ;;  %v156_v51 = vmul.f32 0.70710677, %v150_v49  ;;  %v154_v56 = vmul.f32 0.5, %v150_v49 }
 0x223   :  { %383 = verf.f32 %v156_v51 }
 0x22b   :  { %v382_v52 = vpop.eup %381 }
 0x22c   :  { %v159_v53 = vadd.f32 1.0, %v382_v52 }
 0x22d   :  { %v384_v54 = vpop.eup %383 }
 0x22e   :  { %v160_v57 = vadd.f32 1.0, %v384_v54  ;;  %v161_v58 = vmul.f32 %v159_v53, %v153_v55 }
 0x230   :  { %v162_v59 = vmul.f32 %v160_v57, %v154_v56 }
 0x232   :  { %v165_v60 = vpack.c.bf16 %v162_v59, %v161_v58 }
 0x234   :  { %359 = vmatmul.mubr.bf16.vlgmr.msra.gmra.mrb[0].mxu1 %v165_v60 }
 0x307   :  { %v264_v62 = vpop.f32.mrb[0].mxu1 }
 0x308   :  { %v271_v0 = vadd.f32 %v264_v62, %v163_v61  ;;  %v360_v1 = vpop.f32.mrb[1].mxu1 }
 0x309   :  { %v267_v2 = vpop.f32.mrb[2].mxu1 }
 0x30a   :  { %273 = vst.msk [vmem:[#allocation3] sm:$0xff] %vm34_vm0, %v271_v0  ;;  %v272_v3 = vadd.f32 %v267_v2, %v164_v63  ;;  %v361_v4 = vpop.f32.mrb[3].mxu1 }
 0x30c   :  { %274 = vst.msk [vmem:[#allocation3 + $0x8] sm:$0xff] %vm34_vm0, %v272_v3 }
 0x311   :  { %v278_v6 = vld [vmem:[#allocation3] sm:$0xff] }
 0x312   :  { %v287_v7 = vadd.f32 %v321_v5, %v278_v6 }
 0x313   :  { %v279_v8 = vld [vmem:[#allocation3 + $0x8] sm:$0xff] }
 0x314   :  { %v288_v9 = vadd.f32 %v321_v5, %v279_v8  ;;  %289 = vst.msk [vmem:[#allocation4] sm:$0xff] %vm34_vm0, %v287_v7 }
 0x316   :  { %290 = vst.msk [vmem:[#allocation4 + $0x8] sm:$0xff] %vm34_vm0, %v288_v9 }
 0x317   :  { %396 = shalt.err (!%p393_p4)
}
 0x318   :  { %s397_s30 = scalar_lea.hbm %s533_s7, 256 }
 0x319   :  { %p398_p5 = scmp.ne.s32.totalorder %s533_s7, %s397_s30  ;;  %p401_p6 = scmp.lt.u32.totalorder %s397_s30, %s533_s7 }
 0x31b   :  { %p403_p7 = pnand %p401_p6, %p398_p5 }
 0x31d   :  { %406 = shalt.err (!%p403_p7)
}
 0x31e   :  { %s412_s3 = smov 128   ;;  %s413_s12 = smov 8  }
 0x31f   :  { %302 = dma.vmem_to_hbm [thread:$0]  %s297_s0, 256, %s533_s7, [#allocation5], %s412_s3, %s412_s3, %s413_s12  }
 0x320   :  { %407 = dma.done.wait [#allocation5], 256  }
 0x321   :  { %408 = vsyncadd [#allocation5], 4294967040 }
 0x322   :  { %306 = vsyncpa [#allocation5], 1 }

</bundles_post_ra>
